<compile_context>
chip_gen: v7x
topology: tpu7x:2x2x1
jax: 0.10.0
libtpu: 0.0.40
codegen_flags: <defaults>
</compile_context>

<pallas_src>
import functools

import jax
import jax.numpy as jnp
from jax.experimental import pallas as pl
from jax.experimental.pallas import tpu as pltpu

NUM_CLASSES = 6
NUM_MODELS = 3
K_PAD = 128  # lane-dense per-model logit width


def _round_up(n, m):
    return ((n + m - 1) // m) * m


def ensemble_kernel(w_ref, x_ref, wcat_ref, o_ref, *, num_models, k_pad):
    """Single-step ensemble head.

    w_ref   : SMEM (M,)            softmax-normalized ensemble weights
    x_ref   : VMEM (b_tile, D)     flattened input tile
    wcat_ref: VMEM (D, M * k_pad)  per-model heads, zero-padded to k_pad and
                                   concatenated along the N (lane) dimension
    o_ref   : VMEM (b_tile, k_pad) ensemble logits (lane-dense)
    """
    # One MXU push for all M models at once.
    logits = jnp.dot(x_ref[...], wcat_ref[...],
                     preferred_element_type=jnp.float32)      # (b_tile, M*k_pad)

    # Weighted combine over the M column groups; scalar weights from SMEM,
    # static 128-lane-aligned slices -> pure VPU work.
    acc = w_ref[0] * logits[:, 0:k_pad]
    for m in range(1, num_models):
        acc = acc + w_ref[m] * logits[:, m * k_pad:(m + 1) * k_pad]

    o_ref[...] = acc.astype(o_ref.dtype)


def weighted_average(x, ensemble_weights, model_head_weights, *, k_pad=K_PAD):
    """x: (B, C, H, W) NCHW; ensemble_weights: (M,); model_head_weights: (M, D, K)."""
    B = x.shape[0]
    M, D, K = model_head_weights.shape

    # --- wrapper-side glue (layout plumbing on inputs / params) ---
    x_flat = x.reshape(B, D).astype(jnp.float32)

    # Sublane-aligned batch tile; scales to a real parallel batch axis when B grows.
    b_tile = 256 if B > 256 else _round_up(B, 8)
    B_pad = _round_up(B, b_tile)
    if B_pad != B:
        x_flat = jnp.pad(x_flat, ((0, B_pad - B), (0, 0)))

    # Zero-pad K -> k_pad (lane-dense) and concatenate the M heads along N.
    w_pad = jnp.pad(model_head_weights.astype(jnp.float32),
                    ((0, 0), (0, 0), (0, k_pad - K)))          # (M, D, k_pad)
    w_cat = jnp.transpose(w_pad, (1, 0, 2)).reshape(D, M * k_pad)

    # 3-element softmax of the learned ensemble weights (parameter-side glue).
    norm_w = jax.nn.softmax(ensemble_weights.astype(jnp.float32), axis=-1)  # (M,)

    kernel = functools.partial(ensemble_kernel, num_models=M, k_pad=k_pad)
    out_pad = pl.pallas_call(
        kernel,
        out_shape=jax.ShapeDtypeStruct((B_pad, k_pad), jnp.float32),
        grid=(B_pad // b_tile,),
        in_specs=[
            pl.BlockSpec(memory_space=pltpu.MemorySpace.SMEM),   # ensemble weights
            pl.BlockSpec((b_tile, D), lambda i: (i, 0)),          # input batch tile
            pl.BlockSpec((D, M * k_pad), lambda i: (0, 0)),       # concatenated heads
        ],
        out_specs=pl.BlockSpec((b_tile, k_pad), lambda i: (i, 0)),
        compiler_params=pltpu.CompilerParams(
            dimension_semantics=("parallel",)),                   # batch tiles -> both TCs on v7x
    )(norm_w, x_flat, w_cat)

    return out_pad[:B, :K]


def reference(x, ensemble_weights, model_head_weights):
    B = x.shape[0]
    M, D, K = model_head_weights.shape
    x_flat = x.reshape(B, D).astype(jnp.float32)
    per_model = jnp.einsum("bd,mdk->bkm", x_flat, model_head_weights)  # (B, K, M)
    norm_w = jax.nn.softmax(ensemble_weights, axis=-1)                 # (M,)
    return jnp.sum(norm_w * per_model, axis=-1)                        # (B, K)


if __name__ == "__main__":
    B, C, H, W = 2, 4, 16, 16
    D = C * H * W

    key = jax.random.PRNGKey(0)
    kx, kw = jax.random.split(key)

    x = jax.random.normal(kx, (B, C, H, W), dtype=jnp.float32)
    # surrogate per-model classifier heads (deterministic)
    model_head_weights = 0.01 * jax.random.normal(
        kw, (NUM_MODELS, D, NUM_CLASSES), dtype=jnp.float32)
    # nn.Parameter(torch.ones(len(models)))
    ensemble_weights = jnp.ones((NUM_MODELS,), dtype=jnp.float32)

    out = weighted_average(x, ensemble_weights, model_head_weights)
    out = jax.block_until_ready(out)

    ref = reference(x, ensemble_weights, model_head_weights)
    assert out.shape == (B, NUM_CLASSES)
    assert jnp.allclose(out, ref, atol=1e-5, rtol=1e-5), (out, ref)

    print("KERNEL_OK")
</pallas_src>

<mosaic_0001>
module attributes {stable_mosaic.version = 11 : i64} {
  func.func @ensemble_kernel(%arg0: i32, %arg1: memref<3xf32, #tpu.memory_space<smem>>, %arg2: memref<8x1024xf32, #tpu.memory_space<vmem>>, %arg3: memref<1024x384xf32, #tpu.memory_space<vmem>>, %arg4: memref<8x128xf32, #tpu.memory_space<vmem>>) attributes {dimension_semantics = [#tpu.dimension_semantics<parallel>], iteration_bounds = array<i64: 1>, scalar_prefetch = 0 : i64, scratch_operands = 0 : i64, tpu.core_type = #tpu.core_type<tc>, window_params = [{transform_indices = @transform_0, window_bounds = array<i64: 3>}, {transform_indices = @transform_1, window_bounds = array<i64: 8, 1024>}, {pipeline_mode = #tpu.pipeline_mode<synchronous>, transform_indices = @transform_2, window_bounds = array<i64: 1024, 384>}, {transform_indices = @transform_3, window_bounds = array<i64: 8, 128>}]} {
    %c0 = arith.constant 0 : index
    %c0_0 = arith.constant 0 : index
    %0 = vector.load %arg2[%c0, %c0_0] : memref<8x1024xf32, #tpu.memory_space<vmem>>, vector<8x1024xf32>
    %c0_1 = arith.constant 0 : index
    %c0_2 = arith.constant 0 : index
    %1 = vector.load %arg3[%c0_1, %c0_2] : memref<1024x384xf32, #tpu.memory_space<vmem>>, vector<1024x384xf32>
    %cst = arith.constant dense<0.000000e+00> : vector<8x384xf32>
    %2 = tpu.matmul %0, %1, %cst {dimension_numbers = #tpu.dot_dimension_numbers<[1], [0], [0], [1], [0, 0, 1, 1], [], []>} : vector<8x1024xf32>, vector<1024x384xf32>, vector<8x384xf32> -> vector<8x384xf32>
    %c0_3 = arith.constant 0 : index
    %3 = memref.load %arg1[%c0_3] : memref<3xf32, #tpu.memory_space<smem>>
    %4 = vector.extract_strided_slice %2 {offsets = [0, 0], sizes = [8, 128], strides = [1, 1]} : vector<8x384xf32> to vector<8x128xf32>
    %5 = vector.broadcast %3 : f32 to vector<8x128xf32>
    %6 = arith.mulf %5, %4 : vector<8x128xf32>
    %c1 = arith.constant 1 : index
    %7 = memref.load %arg1[%c1] : memref<3xf32, #tpu.memory_space<smem>>
    %8 = vector.extract_strided_slice %2 {offsets = [0, 128], sizes = [8, 128], strides = [1, 1]} : vector<8x384xf32> to vector<8x128xf32>
    %9 = vector.broadcast %7 : f32 to vector<8x128xf32>
    %10 = arith.mulf %9, %8 : vector<8x128xf32>
    %11 = arith.addf %6, %10 : vector<8x128xf32>
    %c2 = arith.constant 2 : index
    %12 = memref.load %arg1[%c2] : memref<3xf32, #tpu.memory_space<smem>>
    %13 = vector.extract_strided_slice %2 {offsets = [0, 256], sizes = [8, 128], strides = [1, 1]} : vector<8x384xf32> to vector<8x128xf32>
    %14 = vector.broadcast %12 : f32 to vector<8x128xf32>
    %15 = arith.mulf %14, %13 : vector<8x128xf32>
    %16 = arith.addf %11, %15 : vector<8x128xf32>
    %c0_4 = arith.constant 0 : index
    %c0_5 = arith.constant 0 : index
    %17 = vector.load %arg4[%c0_4, %c0_5] : memref<8x128xf32, #tpu.memory_space<vmem>>, vector<8x128xf32>
    tpu.vector_store %arg4[%c0_4, %c0_5], %16 {strides = array<i32>} : memref<8x128xf32, #tpu.memory_space<vmem>>, vector<8x128xf32>,
    return
  }
  func.func @transform_0(%arg0: i32) -> i32 {
    %c0_i32 = arith.constant 0 : i32
    %c0_i32_0 = arith.constant 0 : i32
    return %c0_i32 : i32
  }
  func.func @transform_1(%arg0: i32) -> (i32, i32) {
    %c0_i32 = arith.constant 0 : i32
    %c0_i32_0 = arith.constant 0 : i32
    return %arg0, %c0_i32 : i32, i32
  }
  func.func @transform_2(%arg0: i32) -> (i32, i32) {
    %c0_i32 = arith.constant 0 : i32
    %c0_i32_0 = arith.constant 0 : i32
    %c0_i32_1 = arith.constant 0 : i32
    return %c0_i32, %c0_i32_0 : i32, i32
  }
  func.func @transform_3(%arg0: i32) -> (i32, i32) {
    %c0_i32 = arith.constant 0 : i32
    %c0_i32_0 = arith.constant 0 : i32
    return %arg0, %c0_i32 : i32, i32
  }
}

</mosaic_0001>

<bundles_post_ra>
// kernel: tpu_custom_call.1
= control target key start
LH: loop header
LB: loop body
LE: loop exit
PB: predicated region body
PF: predicated region fallthrough
CT: control target
= control target key end

     0   :  { %8 = vsyncpa [#allocation5], 0  ;;  %s1761_s0 = inlined_call_operand.hbm [shape: f32[3], index: 0, kind: input, shape index: {}]   ;;  %s1762_s1 = inlined_call_operand.hbm [shape: f32[8,1024], index: 1, kind: input, shape index: {}]   ;;  %s1763_s2 = inlined_call_operand.hbm [shape: f32[1024,384], index: 2, kind: input, shape index: {}]   ;;  %s1764_s3 = inlined_call_operand.hbm [shape: f32[8,128], index: 3, kind: output, shape index: {}]  }
   0x1   :  { %9 = vsyncpa [#allocation3], 0 }
   0x2   :  { %10 = vsyncpa [#allocation8], 0 }
   0x3   :  { %11 = vsyncpa [#allocation4], 0  ;;  %s1575_s14 = scalar_lea.hbm %s1761_s0, 16 }
   0x4   :  { %p1576_p0 = scmp.ne.s32.totalorder %s1761_s0, %s1575_s14  ;;  %p1579_p1 = scmp.lt.u32.totalorder %s1575_s14, %s1761_s0 }
   0x6   :  { %p1581_p2 = pnand %p1579_p1, %p1576_p0 }
   0x8   :  { %1584 = shalt.err (!%p1581_p2)
}
   0x9   :  { %s1659_s19 = smov [#allocation2]   ;;  %s1660_s22 = smov [#allocation6]  }
   0xa   :  { %19 = dma.hbm_to_smem %s1761_s0, 16, %s1659_s19, [#allocation5]  }
   0xb   :  { %s26_s23 = sshll.u32 %s1660_s22, 4  ;;  %s1661_s24 = smov [#allocation7]   ;;  %s27_s23 = int_to_ptr.vmem [resolvable:$true] %s26_s23 }
   0xc   :  { %s35_s25 = sshll.u32 %s1661_s24, 4  ;;  %s1585_s28 = scalar_lea.hbm %s1762_s1, 1024  ;;  %s36_s25 = int_to_ptr.vmem [resolvable:$true] %s35_s25 }
   0xd   :  { %p1586_p3 = scmp.ne.s32.totalorder %s1762_s1, %s1585_s28  ;;  %p1589_p4 = scmp.lt.u32.totalorder %s1585_s28, %s1762_s1 }
   0xf   :  { %p1591_p5 = pnand %p1589_p4, %p1586_p3 }
  0x11   :  { %1594 = shalt.err (!%p1591_p5)
}
  0x12   :  { %s1595_s0 = scalar_lea.vmem %s27_s23, 1024  ;;  %p1600_p7 = scmp.lt.s32.totalorder %s27_s23, %s27_s23 }
  0x13   :  { %p1596_p6 = scmp.ne.s32.totalorder %s27_s23, %s1595_s0  ;;  %p1601_p8 = scmp.lt.s32.totalorder %s1595_s0, %s1595_s0 }
  0x15   :  { %p1602_p9 = por %p1601_p8, %p1600_p7 }
  0x17   :  { %p1603_p10 = pnand %p1602_p9, %p1596_p6 }
  0x19   :  { %1606 = shalt.err (!%p1603_p10)
}
  0x1a   :  { %29 = dma.hbm_to_vmem [thread:$0]  %s1762_s1, 1024, %s27_s23, [#allocation3]  }
  0x1b   :  { %s1607_s10 = scalar_lea.hbm %s1763_s2, 49152 }
  0x1c   :  { %p1608_p11 = scmp.ne.s32.totalorder %s1763_s2, %s1607_s10  ;;  %p1611_p12 = scmp.lt.u32.totalorder %s1607_s10, %s1763_s2 }
  0x1e   :  { %p1613_p13 = pnand %p1611_p12, %p1608_p11 }
  0x20   :  { %1616 = shalt.err (!%p1613_p13)
}
  0x21   :  { %s1617_s15 = scalar_lea.vmem %s36_s25, 49152  ;;  %p1622_p1 = scmp.lt.s32.totalorder %s36_s25, %s36_s25 }
  0x22   :  { %p1618_p0 = scmp.ne.s32.totalorder %s36_s25, %s1617_s15  ;;  %p1623_p2 = scmp.lt.s32.totalorder %s1617_s15, %s1617_s15 }
  0x24   :  { %p1624_p3 = por %p1623_p2, %p1622_p1 }
  0x26   :  { %p1625_p4 = pnand %p1624_p3, %p1618_p0 }
  0x28   :  { %1628 = shalt.err (!%p1625_p4)
}
  0x29   :  { %s1662_s1 = smov 384   ;;  %s1663_s16 = smov 24  }
  0x2a   :  { %41 = dma.hbm_to_vmem [thread:$0]  %s1763_s2, 49152, %s36_s25, [#allocation8], %s1662_s1, %s1662_s1, %s1663_s16  }
  0x2b   :  { %1651 = dma.done.wait [#allocation5], 16  }
  0x2c   :  { %1652 = vsyncadd [#allocation5], 4294967280 }
  0x2d   :  { %1653 = dma.done.wait [#allocation3], 1024  }
  0x2e   :  { %1654 = vsyncadd [#allocation3], 4294966272 }
  0x2f   :  { %1655 = dma.done.wait [#allocation8], 49152  }
  0x30   :  { %1656 = vsyncadd [#allocation8], 4294918144 }
  0x31   :  { %51 = sfence }
  0x32   :  { %v61_v0 = vld [vmem:[#allocation7 + $0x8] sm:$0xff]  ;;  %v64_v1 = vld [vmem:[#allocation7 + $0x20] sm:$0xff]  ;;  %v63_v6 = vld [vmem:[#allocation7 + $0x18] sm:$0xff]  ;;  %s1008_s2 = sld [smem:[#allocation2]]  ;;  %s1037_s19 = sld [smem:[#allocation2 + $0x1]] }
  0x33   :  { %v157_v2 = vld [vmem:[#allocation7 + $0x308] sm:$0xff]  ;;  %v1179_v3 = vpack.c.bf16 %v64_v1, %v61_v0  ;;  %v160_v4 = vld [vmem:[#allocation7 + $0x320] sm:$0xff]  ;;  %v159_v10 = vld [vmem:[#allocation7 + $0x318] sm:$0xff]  ;;  %s1038_s20 = sld [smem:[#allocation2 + $0x2]]  ;;  %s1664_s21 = smov [#allocation9]  }
  0x34   :  { %v60_v5 = vld [vmem:[#allocation7] sm:$0xff]  ;;  %v1243_v7 = vpack.c.bf16 %v160_v4, %v157_v2  ;;  %v67_v11 = vld [vmem:[#allocation7 + $0x38] sm:$0xff]  ;;  %v70_v13 = vld [vmem:[#allocation7 + $0x50] sm:$0xff]  ;;  %s1026_s22 = sshll.u32 %s1664_s21, 4  ;;  %s1027_s22 = int_to_ptr.vmem [resolvable:$true] %s1026_s22 }
  0x35   :  { %v1181_v8 = vpack.c.bf16 %v63_v6, %v60_v5  ;;  %v156_v9 = vld [vmem:[#allocation7 + $0x300] sm:$0xff]  ;;  %1180 = vmatprep.subr.bf16.mxu1 %v1179_v3  ;;  %v163_v14 = vld [vmem:[#allocation7 + $0x338] sm:$0xff]  ;;  %v166_v15 = vld [vmem:[#allocation7 + $0x350] sm:$0xff]  ;;  %v1183_v16 = vpack.c.bf16 %v70_v13, %v67_v11  ;;  %s1629_s23 = scalar_lea.vmem %s1027_s22, 128  ;;  %p1634_p6 = scmp.lt.s32.totalorder %s1027_s22, %s1027_s22 }
  0x36   :  { %v1245_v12 = vpack.c.bf16 %v159_v10, %v156_v9  ;;  %1244 = vmatprep.subr.bf16.mxu0 %v1243_v7  ;;  %v1247_v17 = vpack.c.bf16 %v166_v15, %v163_v14  ;;  %v66_v18 = vld [vmem:[#allocation7 + $0x30] sm:$0xff]  ;;  %v69_v19 = vld [vmem:[#allocation7 + $0x48] sm:$0xff]  ;;  %v76_v24 = vld [vmem:[#allocation7 + $0x80] sm:$0xff]  ;;  %p1630_p5 = scmp.ne.s32.totalorder %s1027_s22, %s1629_s23  ;;  %p1635_p7 = scmp.lt.s32.totalorder %s1629_s23, %s1629_s23 }
  0x37   :  { %1182 = vmatpush1.bf16.msra.mxu1 %v1181_v8  ;;  %v162_v20 = vld [vmem:[#allocation7 + $0x330] sm:$0xff]  ;;  %v1185_v21 = vpack.c.bf16 %v69_v19, %v66_v18  ;;  %v165_v22 = vld [vmem:[#allocation7 + $0x348] sm:$0xff]  ;;  %v172_v28 = vld [vmem:[#allocation7 + $0x380] sm:$0xff] }
  0x38   :  { %1246 = vmatpush1.bf16.msra.mxu0 %v1245_v12  ;;  %v73_v23 = vld [vmem:[#allocation7 + $0x68] sm:$0xff]  ;;  %1184 = vmatprep.subr.bf16.mxu1 %v1183_v16  ;;  %v1249_v25 = vpack.c.bf16 %v165_v22, %v162_v20  ;;  %v72_v29 = vld [vmem:[#allocation7 + $0x60] sm:$0xff]  ;;  %v75_v31 = vld [vmem:[#allocation7 + $0x78] sm:$0xff]  ;;  %p1636_p8 = por %p1635_p7, %p1634_p6 }
  0x39   :  { %1248 = vmatprep.subr.bf16.mxu0 %v1247_v17  ;;  %v1187_v26 = vpack.c.bf16 %v76_v24, %v73_v23  ;;  %v169_v27 = vld [vmem:[#allocation7 + $0x368] sm:$0xff]  ;;  %v168_v32 = vld [vmem:[#allocation7 + $0x360] sm:$0xff]  ;;  %v171_v33 = vld [vmem:[#allocation7 + $0x378] sm:$0xff]  ;;  %v1189_v34 = vpack.c.bf16 %v75_v31, %v72_v29 }
  0x3a   :  { %v1251_v30 = vpack.c.bf16 %v172_v28, %v169_v27  ;;  %v79_v35 = vld [vmem:[#allocation7 + $0x98] sm:$0xff]  ;;  %v82_v36 = vld [vmem:[#allocation7 + $0xb0] sm:$0xff]  ;;  %v1253_v38 = vpack.c.bf16 %v171_v33, %v168_v32  ;;  %v81_v42 = vld [vmem:[#allocation7 + $0xa8] sm:$0xff]  ;;  %p1637_p9 = pnand %p1636_p8, %p1630_p5 }
  0x3b   :  { %1186 = vmatpush1.bf16.msra.mxu1 %v1185_v21  ;;  %v175_v37 = vld [vmem:[#allocation7 + $0x398] sm:$0xff]  ;;  %v1191_v39 = vpack.c.bf16 %v82_v36, %v79_v35  ;;  %v178_v40 = vld [vmem:[#allocation7 + $0x3b0] sm:$0xff]  ;;  %v177_v45 = vld [vmem:[#allocation7 + $0x3a8] sm:$0xff] }
  0x3c   :  { %1250 = vmatpush1.bf16.msra.mxu0 %v1249_v25  ;;  %1188 = vmatprep.subr.bf16.mxu1 %v1187_v26  ;;  %v78_v41 = vld [vmem:[#allocation7 + $0x90] sm:$0xff]  ;;  %v1255_v43 = vpack.c.bf16 %v178_v40, %v175_v37  ;;  %v85_v46 = vld [vmem:[#allocation7 + $0xc8] sm:$0xff]  ;;  %v88_v47 = vld [vmem:[#allocation7 + $0xe0] sm:$0xff] }
  0x3d   :  { %1252 = vmatprep.subr.bf16.mxu0 %v1251_v30  ;;  %v174_v44 = vld [vmem:[#allocation7 + $0x390] sm:$0xff]  ;;  %v181_v48 = vld [vmem:[#allocation7 + $0x3c8] sm:$0xff]  ;;  %v184_v49 = vld [vmem:[#allocation7 + $0x3e0] sm:$0xff]  ;;  %v1193_v50 = vpack.c.bf16 %v81_v42, %v78_v41  ;;  %v1195_v52 = vpack.c.bf16 %v88_v47, %v85_v46 }
  0x3e   :  { %v1257_v51 = vpack.c.bf16 %v177_v45, %v174_v44  ;;  %v84_v53 = vld [vmem:[#allocation7 + $0xc0] sm:$0xff]  ;;  %v87_v54 = vld [vmem:[#allocation7 + $0xd8] sm:$0xff]  ;;  %v1259_v56 = vpack.c.bf16 %v184_v49, %v181_v48  ;;  %v94_v59 = vld [vmem:[#allocation7 + $0x110] sm:$0xff] }
  0x3f   :  { %1190 = vmatpush1.bf16.msra.mxu1 %v1189_v34  ;;  %v180_v55 = vld [vmem:[#allocation7 + $0x3c0] sm:$0xff]  ;;  %v183_v57 = vld [vmem:[#allocation7 + $0x3d8] sm:$0xff]  ;;  %v190_v61 = vld [vmem:[#allocation7 + $0x410] sm:$0xff]  ;;  %v1197_v62 = vpack.c.bf16 %v87_v54, %v84_v53 }
  0x40   :  { %1254 = vmatpush1.bf16.msra.mxu0 %v1253_v38  ;;  %1192 = vmatprep.subr.bf16.mxu1 %v1191_v39  ;;  %v91_v58 = vld [vmem:[#allocation7 + $0xf8] sm:$0xff]  ;;  %v1261_v63 = vpack.c.bf16 %v183_v57, %v180_v55  ;;  %v90_v1 = vld [vmem:[#allocation7 + $0xf0] sm:$0xff]  ;;  %v93_v2 = vld [vmem:[#allocation7 + $0x108] sm:$0xff] }
  0x41   :  { %1256 = vmatprep.subr.bf16.mxu0 %v1255_v43  ;;  %v187_v60 = vld [vmem:[#allocation7 + $0x3f8] sm:$0xff]  ;;  %v1199_v0 = vpack.c.bf16 %v94_v59, %v91_v58  ;;  %v186_v3 = vld [vmem:[#allocation7 + $0x3f0] sm:$0xff]  ;;  %v189_v5 = vld [vmem:[#allocation7 + $0x408] sm:$0xff]  ;;  %v1201_v10 = vpack.c.bf16 %v93_v2, %v90_v1 }
  0x42   :  { %v1263_v4 = vpack.c.bf16 %v190_v61, %v187_v60  ;;  %v97_v6 = vld [vmem:[#allocation7 + $0x128] sm:$0xff]  ;;  %v100_v7 = vld [vmem:[#allocation7 + $0x140] sm:$0xff]  ;;  %v1265_v11 = vpack.c.bf16 %v189_v5, %v186_v3  ;;  %v99_v14 = vld [vmem:[#allocation7 + $0x138] sm:$0xff] }
  0x43   :  { %1194 = vmatpush1.bf16.msra.mxu1 %v1193_v50  ;;  %v193_v8 = vld [vmem:[#allocation7 + $0x428] sm:$0xff]  ;;  %v196_v9 = vld [vmem:[#allocation7 + $0x440] sm:$0xff]  ;;  %v1203_v12 = vpack.c.bf16 %v100_v7, %v97_v6  ;;  %v195_v17 = vld [vmem:[#allocation7 + $0x438] sm:$0xff] }
  0x44   :  { %1258 = vmatpush1.bf16.msra.mxu0 %v1257_v51  ;;  %1196 = vmatprep.subr.bf16.mxu1 %v1195_v52  ;;  %v96_v13 = vld [vmem:[#allocation7 + $0x120] sm:$0xff]  ;;  %v1267_v16 = vpack.c.bf16 %v196_v9, %v193_v8  ;;  %v103_v18 = vld [vmem:[#allocation7 + $0x158] sm:$0xff]  ;;  %v106_v19 = vld [vmem:[#allocation7 + $0x170] sm:$0xff] }
  0x45   :  { %1260 = vmatprep.subr.bf16.mxu0 %v1259_v56  ;;  %v192_v15 = vld [vmem:[#allocation7 + $0x420] sm:$0xff]  ;;  %v199_v20 = vld [vmem:[#allocation7 + $0x458] sm:$0xff]  ;;  %v202_v21 = vld [vmem:[#allocation7 + $0x470] sm:$0xff]  ;;  %v1205_v22 = vpack.c.bf16 %v99_v14, %v96_v13  ;;  %v1207_v24 = vpack.c.bf16 %v106_v19, %v103_v18 }
  0x46   :  { %v1269_v23 = vpack.c.bf16 %v195_v17, %v192_v15  ;;  %v102_v25 = vld [vmem:[#allocation7 + $0x150] sm:$0xff]  ;;  %v105_v26 = vld [vmem:[#allocation7 + $0x168] sm:$0xff]  ;;  %v1271_v28 = vpack.c.bf16 %v202_v21, %v199_v20  ;;  %v112_v31 = vld [vmem:[#allocation7 + $0x1a0] sm:$0xff] }
  0x47   :  { %1198 = vmatpush1.bf16.msra.mxu1 %v1197_v62  ;;  %v198_v27 = vld [vmem:[#allocation7 + $0x450] sm:$0xff]  ;;  %v201_v29 = vld [vmem:[#allocation7 + $0x468] sm:$0xff]  ;;  %v208_v33 = vld [vmem:[#allocation7 + $0x4a0] sm:$0xff]  ;;  %v1209_v34 = vpack.c.bf16 %v105_v26, %v102_v25 }
  0x48   :  { %1262 = vmatpush1.bf16.msra.mxu0 %v1261_v63  ;;  %1200 = vmatprep.subr.bf16.mxu1 %v1199_v0  ;;  %v109_v30 = vld [vmem:[#allocation7 + $0x188] sm:$0xff]  ;;  %v1273_v35 = vpack.c.bf16 %v201_v29, %v198_v27  ;;  %v108_v37 = vld [vmem:[#allocation7 + $0x180] sm:$0xff]  ;;  %v111_v38 = vld [vmem:[#allocation7 + $0x198] sm:$0xff] }
  0x49   :  { %1264 = vmatprep.subr.bf16.mxu0 %v1263_v4  ;;  %v205_v32 = vld [vmem:[#allocation7 + $0x488] sm:$0xff]  ;;  %v1211_v36 = vpack.c.bf16 %v112_v31, %v109_v30  ;;  %v204_v39 = vld [vmem:[#allocation7 + $0x480] sm:$0xff]  ;;  %v207_v41 = vld [vmem:[#allocation7 + $0x498] sm:$0xff]  ;;  %v1213_v46 = vpack.c.bf16 %v111_v38, %v108_v37 }
  0x4a   :  { %v1275_v40 = vpack.c.bf16 %v208_v33, %v205_v32  ;;  %v115_v42 = vld [vmem:[#allocation7 + $0x1b8] sm:$0xff]  ;;  %v118_v43 = vld [vmem:[#allocation7 + $0x1d0] sm:$0xff]  ;;  %v1277_v47 = vpack.c.bf16 %v207_v41, %v204_v39  ;;  %v117_v50 = vld [vmem:[#allocation7 + $0x1c8] sm:$0xff] }
  0x4b   :  { %1202 = vmatpush1.bf16.msra.mxu1 %v1201_v10  ;;  %v211_v44 = vld [vmem:[#allocation7 + $0x4b8] sm:$0xff]  ;;  %v214_v45 = vld [vmem:[#allocation7 + $0x4d0] sm:$0xff]  ;;  %v1215_v48 = vpack.c.bf16 %v118_v43, %v115_v42  ;;  %v213_v53 = vld [vmem:[#allocation7 + $0x4c8] sm:$0xff] }
  0x4c   :  { %1266 = vmatpush1.bf16.msra.mxu0 %v1265_v11  ;;  %1204 = vmatprep.subr.bf16.mxu1 %v1203_v12  ;;  %v114_v49 = vld [vmem:[#allocation7 + $0x1b0] sm:$0xff]  ;;  %v1279_v52 = vpack.c.bf16 %v214_v45, %v211_v44  ;;  %v121_v54 = vld [vmem:[#allocation7 + $0x1e8] sm:$0xff]  ;;  %v124_v55 = vld [vmem:[#allocation7 + $0x200] sm:$0xff] }
  0x4d   :  { %1268 = vmatprep.subr.bf16.mxu0 %v1267_v16  ;;  %v210_v51 = vld [vmem:[#allocation7 + $0x4b0] sm:$0xff]  ;;  %v217_v56 = vld [vmem:[#allocation7 + $0x4e8] sm:$0xff]  ;;  %v220_v57 = vld [vmem:[#allocation7 + $0x500] sm:$0xff]  ;;  %v1217_v58 = vpack.c.bf16 %v117_v50, %v114_v49  ;;  %v1219_v60 = vpack.c.bf16 %v124_v55, %v121_v54 }
  0x4e   :  { %v1281_v59 = vpack.c.bf16 %v213_v53, %v210_v51  ;;  %v120_v61 = vld [vmem:[#allocation7 + $0x1e0] sm:$0xff]  ;;  %v123_v62 = vld [vmem:[#allocation7 + $0x1f8] sm:$0xff]  ;;  %v1283_v0 = vpack.c.bf16 %v220_v57, %v217_v56  ;;  %v130_v3 = vld [vmem:[#allocation7 + $0x230] sm:$0xff] }
  0x4f   :  { %1206 = vmatpush1.bf16.msra.mxu1 %v1205_v22  ;;  %v216_v63 = vld [vmem:[#allocation7 + $0x4e0] sm:$0xff]  ;;  %v219_v1 = vld [vmem:[#allocation7 + $0x4f8] sm:$0xff]  ;;  %v226_v5 = vld [vmem:[#allocation7 + $0x530] sm:$0xff]  ;;  %v1221_v6 = vpack.c.bf16 %v123_v62, %v120_v61 }
  0x50   :  { %1270 = vmatpush1.bf16.msra.mxu0 %v1269_v23  ;;  %1208 = vmatprep.subr.bf16.mxu1 %v1207_v24  ;;  %v127_v2 = vld [vmem:[#allocation7 + $0x218] sm:$0xff]  ;;  %v126_v7 = vld [vmem:[#allocation7 + $0x210] sm:$0xff]  ;;  %v1285_v8 = vpack.c.bf16 %v219_v1, %v216_v63  ;;  %v129_v10 = vld [vmem:[#allocation7 + $0x228] sm:$0xff] }
  0x51   :  { %1272 = vmatprep.subr.bf16.mxu0 %v1271_v28  ;;  %v223_v4 = vld [vmem:[#allocation7 + $0x518] sm:$0xff]  ;;  %v1223_v9 = vpack.c.bf16 %v130_v3, %v127_v2  ;;  %v222_v11 = vld [vmem:[#allocation7 + $0x510] sm:$0xff]  ;;  %v225_v12 = vld [vmem:[#allocation7 + $0x528] sm:$0xff]  ;;  %v1225_v20 = vpack.c.bf16 %v129_v10, %v126_v7 }
  0x52   :  { %v1287_v13 = vpack.c.bf16 %v226_v5, %v223_v4  ;;  %v133_v14 = vld [vmem:[#allocation7 + $0x248] sm:$0xff]  ;;  %v136_v15 = vld [vmem:[#allocation7 + $0x260] sm:$0xff]  ;;  %v1724_v19 = vld [vmem:[#allocation6 + $0x18] sm:$0xff]  ;;  %v1289_v21 = vpack.c.bf16 %v225_v12, %v222_v11 }
  0x53   :  { %1210 = vmatpush1.bf16.msra.mxu1 %v1209_v34  ;;  %v1721_v16 = vld [vmem:[#allocation6 + $0x8] sm:$0xff]  ;;  %v232_v18 = vld [vmem:[#allocation7 + $0x560] sm:$0xff]  ;;  %579 = vmatprep.mubr.f32.mxu0 %v1724_v19  ;;  %v1227_v22 = vpack.c.bf16 %v136_v15, %v133_v14  ;;  %v135_v24 = vld [vmem:[#allocation7 + $0x258] sm:$0xff] }
  0x54   :  { %1274 = vmatpush1.bf16.msra.mxu0 %v1273_v35  ;;  %1212 = vmatprep.subr.bf16.mxu1 %v1211_v36  ;;  %v229_v17 = vld [vmem:[#allocation7 + $0x548] sm:$0xff]  ;;  %v132_v23 = vld [vmem:[#allocation7 + $0x240] sm:$0xff]  ;;  %v231_v27 = vld [vmem:[#allocation7 + $0x558] sm:$0xff] }
  0x55   :  { %1276 = vmatprep.subr.bf16.mxu0 %v1275_v40  ;;  %508 = vmatprep.mubr.f32.mxu1 %v1721_v16  ;;  %v228_v25 = vld [vmem:[#allocation7 + $0x540] sm:$0xff]  ;;  %v1291_v26 = vpack.c.bf16 %v232_v18, %v229_v17  ;;  %v139_v28 = vld [vmem:[#allocation7 + $0x278] sm:$0xff]  ;;  %v142_v29 = vld [vmem:[#allocation7 + $0x290] sm:$0xff]  ;;  %v1229_v32 = vpack.c.bf16 %v135_v24, %v132_v23 }
  0x56   :  { %v235_v30 = vld [vmem:[#allocation7 + $0x578] sm:$0xff]  ;;  %v238_v31 = vld [vmem:[#allocation7 + $0x590] sm:$0xff]  ;;  %v1293_v33 = vpack.c.bf16 %v231_v27, %v228_v25  ;;  %v1231_v34 = vpack.c.bf16 %v142_v29, %v139_v28  ;;  %v141_v36 = vld [vmem:[#allocation7 + $0x288] sm:$0xff] }
  0x57   :  { %1214 = vmatpush1.bf16.msra.mxu1 %v1213_v46  ;;  %v138_v35 = vld [vmem:[#allocation7 + $0x270] sm:$0xff]  ;;  %v1295_v38 = vpack.c.bf16 %v238_v31, %v235_v30  ;;  %v237_v39 = vld [vmem:[#allocation7 + $0x588] sm:$0xff]  ;;  %v148_v41 = vld [vmem:[#allocation7 + $0x2c0] sm:$0xff] }
  0x58   :  { %1278 = vmatpush1.bf16.msra.mxu0 %v1277_v47  ;;  %1216 = vmatprep.subr.bf16.mxu1 %v1215_v48  ;;  %v234_v37 = vld [vmem:[#allocation7 + $0x570] sm:$0xff]  ;;  %v145_v40 = vld [vmem:[#allocation7 + $0x2a8] sm:$0xff]  ;;  %v244_v43 = vld [vmem:[#allocation7 + $0x5c0] sm:$0xff]  ;;  %v1233_v44 = vpack.c.bf16 %v141_v36, %v138_v35 }
  0x59   :  { %1280 = vmatprep.subr.bf16.mxu0 %v1279_v52  ;;  %v241_v42 = vld [vmem:[#allocation7 + $0x5a8] sm:$0xff]  ;;  %v1297_v45 = vpack.c.bf16 %v237_v39, %v234_v37  ;;  %v1235_v46 = vpack.c.bf16 %v148_v41, %v145_v40  ;;  %v144_v47 = vld [vmem:[#allocation7 + $0x2a0] sm:$0xff]  ;;  %v147_v48 = vld [vmem:[#allocation7 + $0x2b8] sm:$0xff] }
  0x5a   :  { %v240_v49 = vld [vmem:[#allocation7 + $0x5a0] sm:$0xff]  ;;  %v1299_v50 = vpack.c.bf16 %v244_v43, %v241_v42  ;;  %v243_v51 = vld [vmem:[#allocation7 + $0x5b8] sm:$0xff]  ;;  %v154_v53 = vld [vmem:[#allocation7 + $0x2f0] sm:$0xff]  ;;  %v1237_v56 = vpack.c.bf16 %v147_v48, %v144_v47 }
  0x5b   :  { %1218 = vmatpush1.bf16.msra.mxu1 %v1217_v58  ;;  %v151_v52 = vld [vmem:[#allocation7 + $0x2d8] sm:$0xff]  ;;  %v250_v55 = vld [vmem:[#allocation7 + $0x5f0] sm:$0xff]  ;;  %v1301_v57 = vpack.c.bf16 %v243_v51, %v240_v49  ;;  %v249_v63 = vld [vmem:[#allocation7 + $0x5e8] sm:$0xff] }
  0x5c   :  { %1282 = vmatpush1.bf16.msra.mxu0 %v1281_v59  ;;  %1220 = vmatprep.subr.bf16.mxu1 %v1219_v60  ;;  %v247_v54 = vld [vmem:[#allocation7 + $0x5d8] sm:$0xff]  ;;  %v1239_v58 = vpack.c.bf16 %v154_v53, %v151_v52  ;;  %v150_v59 = vld [vmem:[#allocation7 + $0x2d0] sm:$0xff]  ;;  %v153_v60 = vld [vmem:[#allocation7 + $0x2e8] sm:$0xff] }
  0x5d   :  { %1284 = vmatprep.subr.bf16.mxu0 %v1283_v0  ;;  %v246_v61 = vld [vmem:[#allocation7 + $0x5d0] sm:$0xff]  ;;  %v1303_v62 = vpack.c.bf16 %v250_v55, %v247_v54  ;;  %v113_v1 = vld [vmem:[#allocation7 + $0x1a8] sm:$0xff]  ;;  %v256_v3 = vld [vmem:[#allocation7 + $0x620] sm:$0xff]  ;;  %v1241_v4 = vpack.c.bf16 %v153_v60, %v150_v59 }
  0x5e   :  { %v110_v0 = vld [vmem:[#allocation7 + $0x190] sm:$0xff]  ;;  %v253_v2 = vld [vmem:[#allocation7 + $0x608] sm:$0xff]  ;;  %v1305_v5 = vpack.c.bf16 %v249_v63, %v246_v61  ;;  %v252_v7 = vld [vmem:[#allocation7 + $0x600] sm:$0xff] }
  0x5f   :  { %1222 = vmatpush1.bf16.msra.mxu1 %v1221_v6  ;;  %v1435_v6 = vpack.c.bf16 %v113_v1, %v110_v0  ;;  %v1307_v10 = vpack.c.bf16 %v256_v3, %v253_v2  ;;  %v255_v11 = vld [vmem:[#allocation7 + $0x618] sm:$0xff]  ;;  %v116_v12 = vld [vmem:[#allocation7 + $0x1c0] sm:$0xff]  ;;  %v262_v15 = vld [vmem:[#allocation7 + $0x650] sm:$0xff] }
  0x60   :  { %1286 = vmatpush1.bf16.msra.mxu0 %v1285_v8  ;;  %1224 = vmatprep.subr.bf16.mxu1 %v1223_v9  ;;  %v62_v8 = vld [vmem:[#allocation7 + $0x10] sm:$0xff]  ;;  %v65_v9 = vld [vmem:[#allocation7 + $0x28] sm:$0xff]  ;;  %v259_v14 = vld [vmem:[#allocation7 + $0x638] sm:$0xff] }
  0x61   :  { %1288 = vmatprep.subr.bf16.mxu0 %v1287_v13  ;;  %v119_v13 = vld [vmem:[#allocation7 + $0x1d8] sm:$0xff]  ;;  %v1727_v17 = vld [vmem:[#allocation6] sm:$0xff]  ;;  %v1729_v18 = vld [vmem:[#allocation6 + $0x10] sm:$0xff] }
  0x62   :  { %v258_v23 = vld [vmem:[#allocation7 + $0x630] sm:$0xff]  ;;  %v68_v24 = vld [vmem:[#allocation7 + $0x40] sm:$0xff]  ;;  %v71_v25 = vld [vmem:[#allocation7 + $0x58] sm:$0xff] }
  0x63   :  { %1226 = vmatpush1.bf16.msra.mxu1 %v1225_v20  ;;  %v1437_v20 = vpack.c.bf16 %v65_v9, %v62_v8  ;;  %v261_v27 = vld [vmem:[#allocation7 + $0x648] sm:$0xff]  ;;  %v122_v28 = vld [vmem:[#allocation7 + $0x1f0] sm:$0xff]  ;;  %v268_v31 = vld [vmem:[#allocation7 + $0x680] sm:$0xff] }
  0x64   :  { %1290 = vmatpush1.bf16.msra.mxu0 %v1289_v21  ;;  %1228 = vmatprep.subr.bf16.mxu1 %v1227_v22  ;;  %v1309_v21 = vpack.c.bf16 %v255_v11, %v252_v7  ;;  %v1439_v22 = vpack.c.bf16 %v119_v13, %v116_v12  ;;  %v125_v29 = vld [vmem:[#allocation7 + $0x208] sm:$0xff]  ;;  %v264_v35 = vld [vmem:[#allocation7 + $0x660] sm:$0xff]  ;;  %v74_v36 = vld [vmem:[#allocation7 + $0x70] sm:$0xff] }
  0x65   :  { %1292 = vmatprep.subr.bf16.mxu0 %v1291_v26  ;;  %v1311_v26 = vpack.c.bf16 %v262_v15, %v259_v14  ;;  %v265_v30 = vld [vmem:[#allocation7 + $0x668] sm:$0xff]  ;;  %v267_v39 = vld [vmem:[#allocation7 + $0x678] sm:$0xff]  ;;  %v128_v40 = vld [vmem:[#allocation7 + $0x220] sm:$0xff] }
  0x66   :  { %v77_v37 = vld [vmem:[#allocation7 + $0x88] sm:$0xff]  ;;  %v131_v41 = vld [vmem:[#allocation7 + $0x238] sm:$0xff]  ;;  %v274_v43 = vld [vmem:[#allocation7 + $0x6b0] sm:$0xff] }
  0x67   :  { %1230 = vmatpush1.bf16.msra.mxu1 %v1229_v32  ;;  %v1441_v32 = vpack.c.bf16 %v71_v25, %v68_v24  ;;  %v271_v42 = vld [vmem:[#allocation7 + $0x698] sm:$0xff]  ;;  %v270_v47 = vld [vmem:[#allocation7 + $0x690] sm:$0xff]  ;;  %v80_v48 = vld [vmem:[#allocation7 + $0xa0] sm:$0xff] }
  0x68   :  { %1294 = vmatpush1.bf16.msra.mxu0 %v1293_v33  ;;  %1232 = vmatprep.subr.bf16.mxu1 %v1231_v34  ;;  %v1313_v33 = vpack.c.bf16 %v261_v27, %v258_v23  ;;  %v1443_v34 = vpack.c.bf16 %v125_v29, %v122_v28  ;;  %v83_v49 = vld [vmem:[#allocation7 + $0xb8] sm:$0xff]  ;;  %v273_v51 = vld [vmem:[#allocation7 + $0x6a8] sm:$0xff]  ;;  %v134_v52 = vld [vmem:[#allocation7 + $0x250] sm:$0xff] }
  0x69   :  { %1296 = vmatprep.subr.bf16.mxu0 %v1295_v38  ;;  %v1315_v38 = vpack.c.bf16 %v268_v31, %v265_v30  ;;  %v137_v53 = vld [vmem:[#allocation7 + $0x268] sm:$0xff]  ;;  %v280_v55 = vld [vmem:[#allocation7 + $0x6e0] sm:$0xff]  ;;  %v86_v59 = vld [vmem:[#allocation7 + $0xd0] sm:$0xff] }
  0x6a   :  { %v277_v54 = vld [vmem:[#allocation7 + $0x6c8] sm:$0xff]  ;;  %v140_v63 = vld [vmem:[#allocation7 + $0x280] sm:$0xff]  ;;  %v143_v0 = vld [vmem:[#allocation7 + $0x298] sm:$0xff] }
  0x6b   :  { %1234 = vmatpush1.bf16.msra.mxu1 %v1233_v44  ;;  %v1445_v44 = vpack.c.bf16 %v77_v37, %v74_v36  ;;  %v89_v60 = vld [vmem:[#allocation7 + $0xe8] sm:$0xff]  ;;  %v1323_v61 = vpack.c.bf16 %v280_v55, %v277_v54  ;;  %v283_v1 = vld [vmem:[#allocation7 + $0x6f8] sm:$0xff]  ;;  %v286_v2 = vld [vmem:[#allocation7 + $0x710] sm:$0xff] }
  0x6c   :  { %1298 = vmatpush1.bf16.msra.mxu0 %v1297_v45  ;;  %1236 = vmatprep.subr.bf16.mxu1 %v1235_v46  ;;  %v1317_v45 = vpack.c.bf16 %v267_v39, %v264_v35  ;;  %v1447_v46 = vpack.c.bf16 %v131_v41, %v128_v40  ;;  %v1453_v3 = vpack.c.bf16 %v89_v60, %v86_v59  ;;  %v92_v7 = vld [vmem:[#allocation7 + $0x100] sm:$0xff]  ;;  %v95_v8 = vld [vmem:[#allocation7 + $0x118] sm:$0xff]  ;;  %v146_v11 = vld [vmem:[#allocation7 + $0x2b0] sm:$0xff] }
  0x6d   :  { %1300 = vmatprep.subr.bf16.mxu0 %v1299_v50  ;;  %v1319_v50 = vpack.c.bf16 %v274_v43, %v271_v42  ;;  %v1327_v9 = vpack.c.bf16 %v286_v2, %v283_v1  ;;  %v149_v12 = vld [vmem:[#allocation7 + $0x2c8] sm:$0xff]  ;;  %v292_v14 = vld [vmem:[#allocation7 + $0x740] sm:$0xff]  ;;  %v1457_v15 = vpack.c.bf16 %v95_v8, %v92_v7  ;;  %v291_v23 = vld [vmem:[#allocation7 + $0x738] sm:$0xff] }
  0x6e   :  { %v289_v13 = vld [vmem:[#allocation7 + $0x728] sm:$0xff]  ;;  %v98_v24 = vld [vmem:[#allocation7 + $0x130] sm:$0xff]  ;;  %v152_v27 = vld [vmem:[#allocation7 + $0x2e0] sm:$0xff] }
  0x6f   :  { %1238 = vmatpush1.bf16.msra.mxu1 %v1237_v56  ;;  %v1321_v56 = vpack.c.bf16 %v273_v51, %v270_v47  ;;  %v101_v25 = vld [vmem:[#allocation7 + $0x148] sm:$0xff]  ;;  %v155_v28 = vld [vmem:[#allocation7 + $0x2f8] sm:$0xff]  ;;  %v298_v31 = vld [vmem:[#allocation7 + $0x770] sm:$0xff] }
  0x70   :  { %1302 = vmatpush1.bf16.msra.mxu0 %v1301_v57  ;;  %1240 = vmatprep.subr.bf16.mxu1 %v1239_v58  ;;  %v1451_v57 = vpack.c.bf16 %v137_v53, %v134_v52  ;;  %v276_v58 = vld [vmem:[#allocation7 + $0x6c0] sm:$0xff]  ;;  %v1734_v29 = vld [vmem:[#allocation6 + $0x28] sm:$0xff]  ;;  %v295_v30 = vld [vmem:[#allocation7 + $0x758] sm:$0xff] }
  0x71   :  { %1304 = vmatprep.subr.bf16.mxu0 %v1303_v62  ;;  %v279_v62 = vld [vmem:[#allocation7 + $0x6d8] sm:$0xff]  ;;  %v294_v35 = vld [vmem:[#allocation7 + $0x750] sm:$0xff]  ;;  %v104_v36 = vld [vmem:[#allocation7 + $0x160] sm:$0xff] }
  0x72   :  { %v107_v37 = vld [vmem:[#allocation7 + $0x178] sm:$0xff]  ;;  %v297_v39 = vld [vmem:[#allocation7 + $0x768] sm:$0xff]  ;;  %v206_v40 = vld [vmem:[#allocation7 + $0x490] sm:$0xff] }
  0x73   :  { %1242 = vmatpush1.bf16.msra.mxu1 %v1241_v4  ;;  %v1325_v4 = vpack.c.bf16 %v279_v62, %v276_v58  ;;  %v209_v41 = vld [vmem:[#allocation7 + $0x4a8] sm:$0xff]  ;;  %v304_v43 = vld [vmem:[#allocation7 + $0x7a0] sm:$0xff]  ;;  %v303_v51 = vld [vmem:[#allocation7 + $0x798] sm:$0xff] }
  0x74   :  { %1306 = vmatpush1.bf16.msra.mxu0 %v1305_v5  ;;  %1436 = vmatprep.subr.bf16.mxu1 %v1435_v6  ;;  %v1455_v5 = vpack.c.bf16 %v143_v0, %v140_v63  ;;  %v282_v6 = vld [vmem:[#allocation7 + $0x6f0] sm:$0xff]  ;;  %v301_v42 = vld [vmem:[#allocation7 + $0x788] sm:$0xff]  ;;  %v300_v47 = vld [vmem:[#allocation7 + $0x780] sm:$0xff] }
  0x75   :  { %1308 = vmatprep.subr.bf16.mxu0 %v1307_v10  ;;  %v285_v10 = vld [vmem:[#allocation7 + $0x708] sm:$0xff]  ;;  %v212_v52 = vld [vmem:[#allocation7 + $0x4c0] sm:$0xff]  ;;  %v215_v53 = vld [vmem:[#allocation7 + $0x4d8] sm:$0xff] }
  0x76   :  { %509 = vmatmul.mubr.f32.vlgmr.msra.gmra.mrb[0].mxu1 %v1727_v17  ;;  %v307_v54 = vld [vmem:[#allocation7 + $0x7b8] sm:$0xff]  ;;  %v310_v55 = vld [vmem:[#allocation7 + $0x7d0] sm:$0xff]  ;;  %v164_v59 = vld [vmem:[#allocation7 + $0x340] sm:$0xff] }
  0x77   :  { %580 = vmatmul.mubr.f32.vlgmr.msra.gmra.mrb[0].mxu0 %v1729_v18  ;;  %1438 = vmatpush3.bf16.msra.mxu1 %v1437_v20  ;;  %v288_v20 = vld [vmem:[#allocation7 + $0x720] sm:$0xff]  ;;  %v306_v58 = vld [vmem:[#allocation7 + $0x7b0] sm:$0xff]  ;;  %v167_v60 = vld [vmem:[#allocation7 + $0x358] sm:$0xff] }
  0x78   :  { %1310 = vmatpush1.bf16.msra.mxu0 %v1309_v21  ;;  %1440 = vmatprep.subr.bf16.mxu1 %v1439_v22  ;;  %v1329_v21 = vpack.c.bf16 %v285_v10, %v282_v6  ;;  %v1459_v22 = vpack.c.bf16 %v149_v12, %v146_v11  ;;  %v309_v62 = vld [vmem:[#allocation7 + $0x7c8] sm:$0xff]  ;;  %v218_v63 = vld [vmem:[#allocation7 + $0x4f0] sm:$0xff]  ;;  %v316_v2 = vld [vmem:[#allocation7 + $0x800] sm:$0xff] }
  0x79   :  { %1312 = vmatprep.subr.bf16.mxu0 %v1311_v26  ;;  %792 = vmatprep.mubr.f32.mxu1 %v1721_v16  ;;  %v1449_v16 = vpack.c.bf16 %v83_v49, %v80_v48  ;;  %v1331_v26 = vpack.c.bf16 %v292_v14, %v289_v13  ;;  %v158_v48 = vld [vmem:[#allocation7 + $0x310] sm:$0xff]  ;;  %v161_v49 = vld [vmem:[#allocation7 + $0x328] sm:$0xff]  ;;  %v312_v6 = vld [vmem:[#allocation7 + $0x7e0] sm:$0xff] }
  0x7a   :  { %650 = vmatprep.mubr.f32.mxu0 %v1734_v29  ;;  %v221_v0 = vld [vmem:[#allocation7 + $0x508] sm:$0xff]  ;;  %v170_v7 = vld [vmem:[#allocation7 + $0x370] sm:$0xff]  ;;  %v315_v10 = vld [vmem:[#allocation7 + $0x7f8] sm:$0xff] }
  0x7b   :  { %1442 = vmatpush3.bf16.msra.mxu1 %v1441_v32  ;;  %v1461_v32 = vpack.c.bf16 %v101_v25, %v98_v24  ;;  %v313_v1 = vld [vmem:[#allocation7 + $0x7e8] sm:$0xff]  ;;  %v224_v11 = vld [vmem:[#allocation7 + $0x520] sm:$0xff]  ;;  %v227_v12 = vld [vmem:[#allocation7 + $0x538] sm:$0xff] }
  0x7c   :  { %1314 = vmatpush1.bf16.msra.mxu0 %v1313_v33  ;;  %1444 = vmatprep.subr.bf16.mxu1 %v1443_v34  ;;  %v1333_v33 = vpack.c.bf16 %v291_v23, %v288_v20  ;;  %v1463_v34 = vpack.c.bf16 %v155_v28, %v152_v27  ;;  %v173_v8 = vld [vmem:[#allocation7 + $0x388] sm:$0xff]  ;;  %v319_v13 = vld [vmem:[#allocation7 + $0x818] sm:$0xff]  ;;  %v318_v20 = vld [vmem:[#allocation7 + $0x810] sm:$0xff] }
  0x7d   :  { %1316 = vmatprep.subr.bf16.mxu0 %v1315_v38  ;;  %v1335_v38 = vpack.c.bf16 %v298_v31, %v295_v30  ;;  %v1477_v14 = vpack.c.bf16 %v173_v8, %v170_v7  ;;  %v321_v24 = vld [vmem:[#allocation7 + $0x828] sm:$0xff]  ;;  %v230_v25 = vld [vmem:[#allocation7 + $0x550] sm:$0xff]  ;;  %v328_v28 = vld [vmem:[#allocation7 + $0x860] sm:$0xff] }
  0x7e   :  { %v325_v27 = vld [vmem:[#allocation7 + $0x848] sm:$0xff]  ;;  %v1353_v31 = vpack.c.bf16 %v321_v24, %v318_v20  ;;  %v311_v24 = vld [vmem:[#allocation7 + $0x7d8] sm:$0xff] }
  0x7f   :  { %1446 = vmatpush3.bf16.msra.mxu1 %v1445_v44  ;;  %v1465_v44 = vpack.c.bf16 %v107_v37, %v104_v36  ;;  %v1355_v36 = vpack.c.bf16 %v328_v28, %v325_v27  ;;  %v327_v37 = vld [vmem:[#allocation7 + $0x858] sm:$0xff]  ;;  %v345_v8 = vld [vmem:[#allocation7 + $0x8e8] sm:$0xff]  ;;  %v1739_v27 = vld [vmem:[#allocation6 + $0x20] sm:$0xff] }
  0x80   :  { %1318 = vmatpush1.bf16.msra.mxu0 %v1317_v45  ;;  %1448 = vmatprep.subr.bf16.mxu1 %v1447_v46  ;;  %v1337_v45 = vpack.c.bf16 %v297_v39, %v294_v35  ;;  %v1467_v46 = vpack.c.bf16 %v209_v41, %v206_v40  ;;  %v185_v35 = vld [vmem:[#allocation7 + $0x3e8] sm:$0xff]  ;;  %v239_v39 = vld [vmem:[#allocation7 + $0x598] sm:$0xff]  ;;  %v334_v41 = vld [vmem:[#allocation7 + $0x890] sm:$0xff] }
  0x81   :  { %1320 = vmatprep.subr.bf16.mxu0 %v1319_v50  ;;  %v1339_v50 = vpack.c.bf16 %v304_v43, %v301_v42  ;;  %v331_v40 = vld [vmem:[#allocation7 + $0x878] sm:$0xff]  ;;  %v257_v20 = vld [vmem:[#allocation7 + $0x628] sm:$0xff] }
  0x83   :  { %1450 = vmatpush3.bf16.msra.mxu1 %v1449_v16  ;;  %v1469_v16 = vpack.c.bf16 %v161_v49, %v158_v48  ;;  %v1359_v48 = vpack.c.bf16 %v334_v41, %v331_v40  ;;  %v333_v49 = vld [vmem:[#allocation7 + $0x888] sm:$0xff]  ;;  %v364_v40 = vld [vmem:[#allocation7 + $0x980] sm:$0xff] }
  0x84   :  { %1322 = vmatpush1.bf16.msra.mxu0 %v1321_v56  ;;  %1452 = vmatprep.subr.bf16.mxu1 %v1451_v57  ;;  %v1341_v56 = vpack.c.bf16 %v303_v51, %v300_v47  ;;  %v1471_v57 = vpack.c.bf16 %v215_v53, %v212_v52  ;;  %v191_v47 = vld [vmem:[#allocation7 + $0x418] sm:$0xff]  ;;  %v245_v51 = vld [vmem:[#allocation7 + $0x5c8] sm:$0xff]  ;;  %v340_v53 = vld [vmem:[#allocation7 + $0x8c0] sm:$0xff] }
  0x85   :  { %1324 = vmatprep.subr.bf16.mxu0 %v1323_v61  ;;  %v1343_v61 = vpack.c.bf16 %v310_v55, %v307_v54  ;;  %v337_v52 = vld [vmem:[#allocation7 + $0x8a8] sm:$0xff] }
  0x87   :  { %1454 = vmatpush3.bf16.msra.mxu1 %v1453_v3  ;;  %v1473_v3 = vpack.c.bf16 %v167_v60, %v164_v59  ;;  %v1363_v59 = vpack.c.bf16 %v340_v53, %v337_v52  ;;  %v339_v60 = vld [vmem:[#allocation7 + $0x8b8] sm:$0xff]  ;;  %v370_v52 = vld [vmem:[#allocation7 + $0x9b0] sm:$0xff] }
  0x88   :  { %1326 = vmatpush1.bf16.msra.mxu0 %v1325_v4  ;;  %1456 = vmatprep.subr.bf16.mxu1 %v1455_v5  ;;  %v1345_v4 = vpack.c.bf16 %v309_v62, %v306_v58  ;;  %v1475_v5 = vpack.c.bf16 %v221_v0, %v218_v63  ;;  %v197_v58 = vld [vmem:[#allocation7 + $0x448] sm:$0xff]  ;;  %v251_v62 = vld [vmem:[#allocation7 + $0x5f8] sm:$0xff]  ;;  %v346_v0 = vld [vmem:[#allocation7 + $0x8f0] sm:$0xff] }
  0x89   :  { %1328 = vmatprep.subr.bf16.mxu0 %v1327_v9  ;;  %v1347_v9 = vpack.c.bf16 %v316_v2, %v313_v1  ;;  %v343_v63 = vld [vmem:[#allocation7 + $0x8d8] sm:$0xff] }
  0x8a   :  { %v1367_v7 = vpack.c.bf16 %v346_v0, %v343_v63 }
  0x8b   :  { %1458 = vmatpush3.bf16.msra.mxu1 %v1457_v15  ;;  %v1349_v15 = vpack.c.bf16 %v315_v10, %v312_v6  ;;  %v203_v6 = vld [vmem:[#allocation7 + $0x478] sm:$0xff]  ;;  %v305_v10 = vld [vmem:[#allocation7 + $0x7a8] sm:$0xff] }
  0x8c   :  { %1330 = vmatpush1.bf16.msra.mxu0 %v1329_v21  ;;  %1460 = vmatprep.subr.bf16.mxu1 %v1459_v22  ;;  %v176_v21 = vld [vmem:[#allocation7 + $0x3a0] sm:$0xff]  ;;  %v179_v22 = vld [vmem:[#allocation7 + $0x3b8] sm:$0xff] }
  0x8d   :  { %1332 = vmatprep.subr.bf16.mxu0 %v1331_v26  ;;  %v233_v26 = vld [vmem:[#allocation7 + $0x568] sm:$0xff]  ;;  %v1481_v30 = vpack.c.bf16 %v179_v22, %v176_v21  ;;  %v351_v22 = vld [vmem:[#allocation7 + $0x918] sm:$0xff] }
  0x8f   :  { %1462 = vmatpush3.bf16.msra.mxu1 %v1461_v32  ;;  %v1483_v32 = vpack.c.bf16 %v233_v26, %v230_v25  ;;  %v355_v25 = vld [vmem:[#allocation7 + $0x938] sm:$0xff]  ;;  %v358_v26 = vld [vmem:[#allocation7 + $0x950] sm:$0xff] }
  0x90   :  { %1334 = vmatpush1.bf16.msra.mxu0 %v1333_v33  ;;  %1464 = vmatprep.subr.bf16.mxu1 %v1463_v34  ;;  %v324_v33 = vld [vmem:[#allocation7 + $0x840] sm:$0xff]  ;;  %v182_v34 = vld [vmem:[#allocation7 + $0x3d0] sm:$0xff] }
  0x91   :  { %1336 = vmatprep.subr.bf16.mxu0 %v1335_v38  ;;  %v236_v38 = vld [vmem:[#allocation7 + $0x580] sm:$0xff]  ;;  %v1485_v42 = vpack.c.bf16 %v185_v35, %v182_v34  ;;  %v1357_v43 = vpack.c.bf16 %v327_v37, %v324_v33  ;;  %v263_v34 = vld [vmem:[#allocation7 + $0x658] sm:$0xff]  ;;  %v1375_v35 = vpack.c.bf16 %v358_v26, %v355_v25  ;;  %v314_v37 = vld [vmem:[#allocation7 + $0x7f0] sm:$0xff] }
  0x92   :  { %v260_v33 = vld [vmem:[#allocation7 + $0x640] sm:$0xff] }
  0x93   :  { %1466 = vmatpush3.bf16.msra.mxu1 %v1465_v44  ;;  %v1487_v44 = vpack.c.bf16 %v239_v39, %v236_v38  ;;  %v317_v38 = vld [vmem:[#allocation7 + $0x808] sm:$0xff]  ;;  %v1505_v41 = vpack.c.bf16 %v263_v34, %v260_v33  ;;  %v387_v34 = vld [vmem:[#allocation7 + $0xa38] sm:$0xff] }
  0x94   :  { %1338 = vmatpush1.bf16.msra.mxu0 %v1337_v45  ;;  %1468 = vmatprep.subr.bf16.mxu1 %v1467_v46  ;;  %v330_v45 = vld [vmem:[#allocation7 + $0x870] sm:$0xff]  ;;  %v188_v46 = vld [vmem:[#allocation7 + $0x400] sm:$0xff]  ;;  %v361_v39 = vld [vmem:[#allocation7 + $0x968] sm:$0xff] }
  0x95   :  { %1340 = vmatprep.subr.bf16.mxu0 %v1339_v50  ;;  %v242_v50 = vld [vmem:[#allocation7 + $0x5b0] sm:$0xff]  ;;  %v1489_v54 = vpack.c.bf16 %v191_v47, %v188_v46  ;;  %v1361_v55 = vpack.c.bf16 %v333_v49, %v330_v45  ;;  %v360_v45 = vld [vmem:[#allocation7 + $0x960] sm:$0xff]  ;;  %v269_v47 = vld [vmem:[#allocation7 + $0x688] sm:$0xff] }
  0x96   :  { %793 = vmatmul.mubr.f32.vlgmr.msra.gmra.mrb[2].mxu1 %v1727_v17  ;;  %v322_v17 = vld [vmem:[#allocation7 + $0x830] sm:$0xff]  ;;  %v363_v49 = vld [vmem:[#allocation7 + $0x978] sm:$0xff] }
  0x97   :  { %1470 = vmatpush3.bf16.msra.mxu1 %v1469_v16  ;;  %862 = vmatprep.mubr.f32.mxu1 %v1724_v19  ;;  %v1479_v19 = vpack.c.bf16 %v227_v12, %v224_v11  ;;  %v1351_v23 = vpack.c.bf16 %v322_v17, %v319_v13  ;;  %v1491_v16 = vpack.c.bf16 %v245_v51, %v242_v50  ;;  %v349_v11 = vld [vmem:[#allocation7 + $0x908] sm:$0xff]  ;;  %v352_v12 = vld [vmem:[#allocation7 + $0x920] sm:$0xff]  ;;  %v266_v46 = vld [vmem:[#allocation7 + $0x670] sm:$0xff] }
  0x98   :  { %1342 = vmatpush1.bf16.msra.mxu0 %v1341_v56  ;;  %1472 = vmatprep.subr.bf16.mxu1 %v1471_v57  ;;  %v336_v56 = vld [vmem:[#allocation7 + $0x8a0] sm:$0xff]  ;;  %v194_v57 = vld [vmem:[#allocation7 + $0x430] sm:$0xff]  ;;  %v1371_v21 = vpack.c.bf16 %v352_v12, %v349_v11  ;;  %v367_v51 = vld [vmem:[#allocation7 + $0x998] sm:$0xff]  ;;  %v1509_v53 = vpack.c.bf16 %v269_v47, %v266_v46 }
  0x99   :  { %1344 = vmatprep.subr.bf16.mxu0 %v1343_v61  ;;  %v248_v61 = vld [vmem:[#allocation7 + $0x5e0] sm:$0xff]  ;;  %v1493_v1 = vpack.c.bf16 %v197_v58, %v194_v57  ;;  %v1365_v2 = vpack.c.bf16 %v339_v60, %v336_v56  ;;  %v275_v57 = vld [vmem:[#allocation7 + $0x6b8] sm:$0xff]  ;;  %v1383_v58 = vpack.c.bf16 %v370_v52, %v367_v51  ;;  %v326_v60 = vld [vmem:[#allocation7 + $0x850] sm:$0xff] }
  0x9a   :  { %v320_v50 = vld [vmem:[#allocation7 + $0x820] sm:$0xff]  ;;  %v393_v47 = vld [vmem:[#allocation7 + $0xa68] sm:$0xff] }
  0x9b   :  { %1474 = vmatpush3.bf16.msra.mxu1 %v1473_v3  ;;  %v1495_v3 = vpack.c.bf16 %v251_v62, %v248_v61  ;;  %v272_v56 = vld [vmem:[#allocation7 + $0x6a0] sm:$0xff]  ;;  %v329_v61 = vld [vmem:[#allocation7 + $0x868] sm:$0xff] }
  0x9c   :  { %1346 = vmatpush1.bf16.msra.mxu0 %v1345_v4  ;;  %1476 = vmatprep.subr.bf16.mxu1 %v1475_v5  ;;  %v342_v4 = vld [vmem:[#allocation7 + $0x8d0] sm:$0xff]  ;;  %v200_v5 = vld [vmem:[#allocation7 + $0x460] sm:$0xff]  ;;  %v373_v62 = vld [vmem:[#allocation7 + $0x9c8] sm:$0xff]  ;;  %v1513_v63 = vpack.c.bf16 %v275_v57, %v272_v56 }
  0x9d   :  { %1348 = vmatprep.subr.bf16.mxu0 %v1347_v9  ;;  %v302_v9 = vld [vmem:[#allocation7 + $0x790] sm:$0xff]  ;;  %v1497_v13 = vpack.c.bf16 %v203_v6, %v200_v5  ;;  %v1369_v17 = vpack.c.bf16 %v345_v8, %v342_v4  ;;  %v281_v4 = vld [vmem:[#allocation7 + $0x6e8] sm:$0xff]  ;;  %v375_v6 = vld [vmem:[#allocation7 + $0x9d8] sm:$0xff] }
  0x9e   :  { %v335_v8 = vld [vmem:[#allocation7 + $0x898] sm:$0xff] }
  0x9f   :  { %1478 = vmatpush3.bf16.msra.mxu1 %v1477_v14  ;;  %v1499_v14 = vpack.c.bf16 %v305_v10, %v302_v9  ;;  %v379_v9 = vld [vmem:[#allocation7 + $0x9f8] sm:$0xff]  ;;  %v382_v10 = vld [vmem:[#allocation7 + $0xa10] sm:$0xff] }
  0xa0   :  { %1350 = vmatpush1.bf16.msra.mxu0 %v1349_v15  ;;  %1480 = vmatprep.subr.bf16.mxu1 %v1479_v19  ;;  %v348_v15 = vld [vmem:[#allocation7 + $0x900] sm:$0xff]  ;;  %v254_v19 = vld [vmem:[#allocation7 + $0x610] sm:$0xff]  ;;  %v399_v57 = vld [vmem:[#allocation7 + $0xa98] sm:$0xff] }
  0xa1   :  { %1352 = vmatprep.subr.bf16.mxu0 %v1351_v23  ;;  %v308_v23 = vld [vmem:[#allocation7 + $0x7c0] sm:$0xff]  ;;  %v1501_v28 = vpack.c.bf16 %v257_v20, %v254_v19  ;;  %v1391_v19 = vpack.c.bf16 %v382_v10, %v379_v9  ;;  %v381_v20 = vld [vmem:[#allocation7 + $0xa08] sm:$0xff] }
  0xa3   :  { %1482 = vmatpush3.bf16.msra.mxu1 %v1481_v30  ;;  %v1373_v30 = vpack.c.bf16 %v351_v22, %v348_v15  ;;  %v287_v15 = vld [vmem:[#allocation7 + $0x718] sm:$0xff]  ;;  %v341_v22 = vld [vmem:[#allocation7 + $0x8c8] sm:$0xff] }
  0xa4   :  { %1354 = vmatpush1.bf16.msra.mxu0 %v1353_v31  ;;  %1484 = vmatprep.subr.bf16.mxu1 %v1483_v32  ;;  %v1503_v31 = vpack.c.bf16 %v311_v24, %v308_v23  ;;  %v354_v32 = vld [vmem:[#allocation7 + $0x930] sm:$0xff]  ;;  %v385_v23 = vld [vmem:[#allocation7 + $0xa28] sm:$0xff]  ;;  %v388_v24 = vld [vmem:[#allocation7 + $0xa40] sm:$0xff] }
  0xa5   :  { %1356 = vmatprep.subr.bf16.mxu0 %v1355_v36  ;;  %v357_v36 = vld [vmem:[#allocation7 + $0x948] sm:$0xff]  ;;  %v1395_v33 = vpack.c.bf16 %v388_v24, %v385_v23  ;;  %v414_v24 = vld [vmem:[#allocation7 + $0xb10] sm:$0xff] }
  0xa7   :  { %1486 = vmatpush3.bf16.msra.mxu1 %v1485_v42  ;;  %v1743_v42 = vld [vmem:[#allocation6 + $0x38] sm:$0xff] }
  0xa8   :  { %1358 = vmatpush1.bf16.msra.mxu0 %v1357_v43  ;;  %1488 = vmatprep.subr.bf16.mxu1 %v1487_v44  ;;  %v1377_v43 = vpack.c.bf16 %v357_v36, %v354_v32  ;;  %v1507_v44 = vpack.c.bf16 %v317_v38, %v314_v37  ;;  %v293_v32 = vld [vmem:[#allocation7 + $0x748] sm:$0xff]  ;;  %v347_v36 = vld [vmem:[#allocation7 + $0x8f8] sm:$0xff]  ;;  %v394_v38 = vld [vmem:[#allocation7 + $0xa70] sm:$0xff] }
  0xa9   :  { %1360 = vmatprep.subr.bf16.mxu0 %v1359_v48  ;;  %v1379_v48 = vpack.c.bf16 %v364_v40, %v361_v39  ;;  %v391_v37 = vld [vmem:[#allocation7 + $0xa58] sm:$0xff] }
  0xaa   :  { %v1399_v46 = vpack.c.bf16 %v394_v38, %v391_v37  ;;  %v420_v38 = vld [vmem:[#allocation7 + $0xb40] sm:$0xff] }
  0xab   :  { %1490 = vmatpush3.bf16.msra.mxu1 %v1489_v54  ;;  %v1381_v54 = vpack.c.bf16 %v363_v49, %v360_v45  ;;  %v299_v45 = vld [vmem:[#allocation7 + $0x778] sm:$0xff]  ;;  %v401_v49 = vld [vmem:[#allocation7 + $0xaa8] sm:$0xff] }
  0xac   :  { %1362 = vmatpush1.bf16.msra.mxu0 %v1361_v55  ;;  %1492 = vmatprep.subr.bf16.mxu1 %v1491_v16  ;;  %v366_v16 = vld [vmem:[#allocation7 + $0x990] sm:$0xff] }
  0xad   :  { %1364 = vmatprep.subr.bf16.mxu0 %v1363_v59  ;;  %v369_v59 = vld [vmem:[#allocation7 + $0x9a8] sm:$0xff] }
  0xae   :  { %v1385_v0 = vpack.c.bf16 %v369_v59, %v366_v16  ;;  %v353_v16 = vld [vmem:[#allocation7 + $0x928] sm:$0xff]  ;;  %v407_v59 = vld [vmem:[#allocation7 + $0xad8] sm:$0xff] }
  0xaf   :  { %1494 = vmatpush3.bf16.msra.mxu1 %v1493_v1  ;;  %v1515_v1 = vpack.c.bf16 %v329_v61, %v326_v60  ;;  %v403_v60 = vld [vmem:[#allocation7 + $0xab8] sm:$0xff]  ;;  %v406_v61 = vld [vmem:[#allocation7 + $0xad0] sm:$0xff] }
  0xb0   :  { %1366 = vmatpush1.bf16.msra.mxu0 %v1365_v2  ;;  %1496 = vmatprep.subr.bf16.mxu1 %v1495_v3  ;;  %v372_v2 = vld [vmem:[#allocation7 + $0x9c0] sm:$0xff]  ;;  %v278_v3 = vld [vmem:[#allocation7 + $0x6d0] sm:$0xff] }
  0xb1   :  { %1368 = vmatprep.subr.bf16.mxu0 %v1367_v7  ;;  %v332_v7 = vld [vmem:[#allocation7 + $0x880] sm:$0xff]  ;;  %v1517_v11 = vpack.c.bf16 %v281_v4, %v278_v3  ;;  %v1389_v12 = vpack.c.bf16 %v375_v6, %v372_v2  ;;  %v359_v2 = vld [vmem:[#allocation7 + $0x958] sm:$0xff]  ;;  %v1407_v3 = vpack.c.bf16 %v406_v61, %v403_v60  ;;  %v405_v4 = vld [vmem:[#allocation7 + $0xac8] sm:$0xff] }
  0xb2   :  { %v413_v6 = vld [vmem:[#allocation7 + $0xb08] sm:$0xff]  ;;  %v432_v61 = vld [vmem:[#allocation7 + $0xba0] sm:$0xff] }
  0xb3   :  { %1498 = vmatpush3.bf16.msra.mxu1 %v1497_v13  ;;  %v1519_v13 = vpack.c.bf16 %v335_v8, %v332_v7  ;;  %v409_v7 = vld [vmem:[#allocation7 + $0xae8] sm:$0xff]  ;;  %v412_v8 = vld [vmem:[#allocation7 + $0xb00] sm:$0xff] }
  0xb4   :  { %1370 = vmatpush1.bf16.msra.mxu0 %v1369_v17  ;;  %1500 = vmatprep.subr.bf16.mxu1 %v1499_v14  ;;  %v378_v17 = vld [vmem:[#allocation7 + $0x9f0] sm:$0xff]  ;;  %v284_v14 = vld [vmem:[#allocation7 + $0x700] sm:$0xff] }
  0xb5   :  { %1372 = vmatprep.subr.bf16.mxu0 %v1371_v21  ;;  %v338_v21 = vld [vmem:[#allocation7 + $0x8b0] sm:$0xff]  ;;  %v1521_v25 = vpack.c.bf16 %v287_v15, %v284_v14  ;;  %v1393_v26 = vpack.c.bf16 %v381_v20, %v378_v17  ;;  %v365_v17 = vld [vmem:[#allocation7 + $0x988] sm:$0xff]  ;;  %v1411_v14 = vpack.c.bf16 %v412_v8, %v409_v7  ;;  %v411_v15 = vld [vmem:[#allocation7 + $0xaf8] sm:$0xff] }
  0xb6   :  { %863 = vmatmul.mubr.f32.vlgmr.msra.gmra.mrb[4].mxu1 %v1729_v18  ;;  %v323_v18 = vld [vmem:[#allocation7 + $0x838] sm:$0xff]  ;;  %v392_v8 = vld [vmem:[#allocation7 + $0xa60] sm:$0xff] }
  0xb7   :  { %651 = vmatmul.mubr.f32.vlgmr.msra.gmra.mrb[0].mxu0 %v1739_v27  ;;  %1502 = vmatpush3.bf16.msra.mxu1 %v1501_v28  ;;  %v1511_v55 = vpack.c.bf16 %v323_v18, %v320_v50  ;;  %v1523_v28 = vpack.c.bf16 %v341_v22, %v338_v21  ;;  %v397_v50 = vld [vmem:[#allocation7 + $0xa88] sm:$0xff]  ;;  %v400_v18 = vld [vmem:[#allocation7 + $0xaa0] sm:$0xff]  ;;  %v419_v20 = vld [vmem:[#allocation7 + $0xb38] sm:$0xff] }
  0xb8   :  { %1374 = vmatpush1.bf16.msra.mxu0 %v1373_v30  ;;  %1504 = vmatprep.subr.bf16.mxu1 %v1503_v31  ;;  %v384_v30 = vld [vmem:[#allocation7 + $0xa20] sm:$0xff]  ;;  %v290_v31 = vld [vmem:[#allocation7 + $0x730] sm:$0xff]  ;;  %v1403_v56 = vpack.c.bf16 %v400_v18, %v397_v50  ;;  %v415_v21 = vld [vmem:[#allocation7 + $0xb18] sm:$0xff] }
  0xb9   :  { %1376 = vmatprep.subr.bf16.mxu0 %v1375_v35  ;;  %932 = vmatprep.mubr.f32.mxu1 %v1734_v29  ;;  %v376_v29 = vld [vmem:[#allocation7 + $0x9e0] sm:$0xff]  ;;  %v1525_v39 = vpack.c.bf16 %v293_v32, %v290_v31  ;;  %v1397_v40 = vpack.c.bf16 %v387_v34, %v384_v30  ;;  %v417_v30 = vld [vmem:[#allocation7 + $0xb28] sm:$0xff]  ;;  %v422_v31 = vld [vmem:[#allocation7 + $0xb50] sm:$0xff] }
  0xba   :  { %721 = vmatprep.mubr.f32.mxu0 %v1743_v42  ;;  %v1387_v5 = vpack.c.bf16 %v376_v29, %v373_v62  ;;  %v344_v35 = vld [vmem:[#allocation7 + $0x8e0] sm:$0xff]  ;;  %v425_v32 = vld [vmem:[#allocation7 + $0xb68] sm:$0xff]  ;;  %v426_v18 = vld [vmem:[#allocation7 + $0xb70] sm:$0xff] }
  0xbb   :  { %1506 = vmatpush3.bf16.msra.mxu1 %v1505_v41  ;;  %v1527_v41 = vpack.c.bf16 %v347_v36, %v344_v35  ;;  %v424_v34 = vld [vmem:[#allocation7 + $0xb60] sm:$0xff]  ;;  %v1417_v36 = vpack.c.bf16 %v417_v30, %v414_v24  ;;  %v1547_v37 = vpack.c.bf16 %v425_v32, %v422_v31 }
  0xbc   :  { %1378 = vmatpush1.bf16.msra.mxu0 %v1377_v43  ;;  %1508 = vmatprep.subr.bf16.mxu1 %v1507_v44  ;;  %v390_v43 = vld [vmem:[#allocation7 + $0xa50] sm:$0xff]  ;;  %v296_v44 = vld [vmem:[#allocation7 + $0x760] sm:$0xff] }
  0xbd   :  { %1380 = vmatprep.subr.bf16.mxu0 %v1379_v48  ;;  %v398_v48 = vld [vmem:[#allocation7 + $0xa90] sm:$0xff]  ;;  %v1529_v51 = vpack.c.bf16 %v299_v45, %v296_v44  ;;  %v1401_v52 = vpack.c.bf16 %v393_v47, %v390_v43  ;;  %v423_v43 = vld [vmem:[#allocation7 + $0xb58] sm:$0xff]  ;;  %v428_v44 = vld [vmem:[#allocation7 + $0xb80] sm:$0xff] }
  0xbe   :  { %v431_v45 = vld [vmem:[#allocation7 + $0xb98] sm:$0xff]  ;;  %v430_v47 = vld [vmem:[#allocation7 + $0xb90] sm:$0xff] }
  0xbf   :  { %1510 = vmatpush3.bf16.msra.mxu1 %v1509_v53  ;;  %v1531_v53 = vpack.c.bf16 %v401_v49, %v398_v48  ;;  %v1421_v49 = vpack.c.bf16 %v423_v43, %v420_v38  ;;  %v1551_v50 = vpack.c.bf16 %v431_v45, %v428_v44 }
  0xc0   :  { %1382 = vmatpush1.bf16.msra.mxu0 %v1381_v54  ;;  %1512 = vmatprep.subr.bf16.mxu1 %v1511_v55  ;;  %v396_v54 = vld [vmem:[#allocation7 + $0xa80] sm:$0xff]  ;;  %v350_v55 = vld [vmem:[#allocation7 + $0x910] sm:$0xff] }
  0xc1   :  { %1384 = vmatprep.subr.bf16.mxu0 %v1383_v58  ;;  %v404_v58 = vld [vmem:[#allocation7 + $0xac0] sm:$0xff]  ;;  %v1533_v62 = vpack.c.bf16 %v353_v16, %v350_v55  ;;  %v1405_v29 = vpack.c.bf16 %v399_v57, %v396_v54  ;;  %v429_v54 = vld [vmem:[#allocation7 + $0xb88] sm:$0xff]  ;;  %v434_v55 = vld [vmem:[#allocation7 + $0xbb0] sm:$0xff] }
  0xc2   :  { %v437_v16 = vld [vmem:[#allocation7 + $0xbc8] sm:$0xff]  ;;  %v436_v57 = vld [vmem:[#allocation7 + $0xbc0] sm:$0xff] }
  0xc3   :  { %1514 = vmatpush3.bf16.msra.mxu1 %v1513_v63  ;;  %v1535_v63 = vpack.c.bf16 %v407_v59, %v404_v58  ;;  %v1425_v59 = vpack.c.bf16 %v429_v54, %v426_v18  ;;  %v1555_v60 = vpack.c.bf16 %v437_v16, %v434_v55 }
  0xc4   :  { %1386 = vmatpush1.bf16.msra.mxu0 %v1385_v0  ;;  %1516 = vmatprep.subr.bf16.mxu1 %v1515_v1  ;;  %v402_v0 = vld [vmem:[#allocation7 + $0xab0] sm:$0xff]  ;;  %v356_v1 = vld [vmem:[#allocation7 + $0x940] sm:$0xff] }
  0xc5   :  { %1388 = vmatprep.subr.bf16.mxu0 %v1387_v5  ;;  %v410_v5 = vld [vmem:[#allocation7 + $0xaf0] sm:$0xff]  ;;  %v1537_v9 = vpack.c.bf16 %v359_v2, %v356_v1  ;;  %v1409_v10 = vpack.c.bf16 %v405_v4, %v402_v0  ;;  %v435_v0 = vld [vmem:[#allocation7 + $0xbb8] sm:$0xff]  ;;  %v440_v1 = vld [vmem:[#allocation7 + $0xbe0] sm:$0xff] }
  0xc6   :  { %v443_v2 = vld [vmem:[#allocation7 + $0xbf8] sm:$0xff]  ;;  %v442_v4 = vld [vmem:[#allocation7 + $0xbf0] sm:$0xff] }
  0xc7   :  { %1518 = vmatpush3.bf16.msra.mxu1 %v1517_v11  ;;  %v1539_v11 = vpack.c.bf16 %v413_v6, %v410_v5  ;;  %v1429_v6 = vpack.c.bf16 %v435_v0, %v432_v61  ;;  %v1559_v7 = vpack.c.bf16 %v443_v2, %v440_v1 }
  0xc8   :  { %1390 = vmatpush1.bf16.msra.mxu0 %v1389_v12  ;;  %1520 = vmatprep.subr.bf16.mxu1 %v1519_v13  ;;  %v408_v12 = vld [vmem:[#allocation7 + $0xae0] sm:$0xff]  ;;  %v362_v13 = vld [vmem:[#allocation7 + $0x970] sm:$0xff] }
  0xc9   :  { %1392 = vmatprep.subr.bf16.mxu0 %v1391_v19  ;;  %v416_v19 = vld [vmem:[#allocation7 + $0xb20] sm:$0xff]  ;;  %v1541_v22 = vpack.c.bf16 %v365_v17, %v362_v13  ;;  %v1413_v23 = vpack.c.bf16 %v411_v15, %v408_v12  ;;  %v441_v12 = vld [vmem:[#allocation7 + $0xbe8] sm:$0xff] }
  0xcb   :  { %1522 = vmatpush3.bf16.msra.mxu1 %v1521_v25  ;;  %v368_v25 = vld [vmem:[#allocation7 + $0x9a0] sm:$0xff] }
  0xcc   :  { %1394 = vmatpush1.bf16.msra.mxu0 %v1393_v26  ;;  %1524 = vmatprep.subr.bf16.mxu1 %v1523_v28  ;;  %v371_v26 = vld [vmem:[#allocation7 + $0x9b8] sm:$0xff] }
  0xcd   :  { %1396 = vmatprep.subr.bf16.mxu0 %v1395_v33  ;;  %v421_v33 = vld [vmem:[#allocation7 + $0xb48] sm:$0xff]  ;;  %v1545_v35 = vpack.c.bf16 %v371_v26, %v368_v25 }
  0xcf   :  { %1526 = vmatpush3.bf16.msra.mxu1 %v1525_v39  ;;  %v374_v39 = vld [vmem:[#allocation7 + $0x9d0] sm:$0xff] }
  0xd0   :  { %1398 = vmatpush1.bf16.msra.mxu0 %v1397_v40  ;;  %1528 = vmatprep.subr.bf16.mxu1 %v1527_v41  ;;  %v377_v40 = vld [vmem:[#allocation7 + $0x9e8] sm:$0xff]  ;;  %v1419_v41 = vpack.c.bf16 %v424_v34, %v421_v33  ;;  %v1009_v33 = vstv %s1008_s2 }
  0xd1   :  { %1400 = vmatprep.subr.bf16.mxu0 %v1399_v46  ;;  %v427_v46 = vld [vmem:[#allocation7 + $0xb78] sm:$0xff]  ;;  %v1549_v48 = vpack.c.bf16 %v377_v40, %v374_v39  ;;  %v1016_v40 = vstv %s1038_s20 }
  0xd3   :  { %1530 = vmatpush3.bf16.msra.mxu1 %v1529_v51  ;;  %v380_v51 = vld [vmem:[#allocation7 + $0xa00] sm:$0xff] }
  0xd4   :  { %1402 = vmatpush1.bf16.msra.mxu0 %v1401_v52  ;;  %1532 = vmatprep.subr.bf16.mxu1 %v1531_v53  ;;  %v383_v52 = vld [vmem:[#allocation7 + $0xa18] sm:$0xff]  ;;  %v1423_v53 = vpack.c.bf16 %v430_v47, %v427_v46 }
  0xd5   :  { %1404 = vmatprep.subr.bf16.mxu0 %v1403_v56  ;;  %v433_v56 = vld [vmem:[#allocation7 + $0xba8] sm:$0xff]  ;;  %v1553_v58 = vpack.c.bf16 %v383_v52, %v380_v51 }
  0xd6   :  { %933 = vmatmul.mubr.f32.vlgmr.msra.gmra.mrb[6].mxu1 %v1739_v27  ;;  %v418_v27 = vld [vmem:[#allocation7 + $0xb30] sm:$0xff] }
  0xd7   :  { %1534 = vmatpush3.bf16.msra.mxu1 %v1533_v62  ;;  %1002 = vmatprep.mubr.f32.mxu1 %v1743_v42  ;;  %v1543_v42 = vpack.c.bf16 %v419_v20, %v416_v19  ;;  %v1415_v28 = vpack.c.bf16 %v418_v27, %v415_v21  ;;  %v386_v62 = vld [vmem:[#allocation7 + $0xa30] sm:$0xff] }
  0xd8   :  { %1406 = vmatpush1.bf16.msra.mxu0 %v1405_v29  ;;  %1536 = vmatprep.subr.bf16.mxu1 %v1535_v63  ;;  %v389_v29 = vld [vmem:[#allocation7 + $0xa48] sm:$0xff]  ;;  %v1427_v63 = vpack.c.bf16 %v436_v57, %v433_v56 }
  0xd9   :  { %1408 = vmatprep.subr.bf16.mxu0 %v1407_v3  ;;  %v439_v3 = vld [vmem:[#allocation7 + $0xbd8] sm:$0xff]  ;;  %v1557_v5 = vpack.c.bf16 %v389_v29, %v386_v62 }
  0xdb   :  { %1538 = vmatpush3.bf16.msra.mxu1 %v1537_v9  ;;  %v395_v9 = vld [vmem:[#allocation7 + $0xa78] sm:$0xff] }
  0xdc   :  { %1410 = vmatpush1.bf16.msra.mxu0 %v1409_v10  ;;  %1540 = vmatprep.subr.bf16.mxu1 %v1539_v11  ;;  %v1431_v10 = vpack.c.bf16 %v442_v4, %v439_v3  ;;  %v438_v11 = vld [vmem:[#allocation7 + $0xbd0] sm:$0xff]  ;;  %v1561_v13 = vpack.c.bf16 %v395_v9, %v392_v8 }
  0xdd   :  { %1412 = vmatprep.subr.bf16.mxu0 %v1411_v14  ;;  %v1433_v17 = vpack.c.bf16 %v441_v12, %v438_v11  ;;  %v58_v14 = vld [vmem:[#allocation6 + $0x30] sm:$0xff] }
  0xdf   :  { %1542 = vmatpush3.bf16.msra.mxu1 %v1541_v22 }
  0xe0   :  { %1414 = vmatpush1.bf16.msra.mxu0 %v1413_v23  ;;  %1544 = vmatprep.subr.bf16.mxu1 %v1543_v42 }
  0xe1   :  { %1416 = vmatprep.subr.bf16.mxu0 %v1415_v28 }
  0xe3   :  { %1546 = vmatpush3.bf16.msra.mxu1 %v1545_v35 }
  0xe4   :  { %1418 = vmatpush1.bf16.msra.mxu0 %v1417_v36  ;;  %1548 = vmatprep.subr.bf16.mxu1 %v1547_v37  ;;  %v1012_v37 = vstv %s1037_s19 }
  0xe5   :  { %1420 = vmatprep.subr.bf16.mxu0 %v1419_v41 }
  0xe7   :  { %1550 = vmatpush3.bf16.msra.mxu1 %v1549_v48 }
  0xe8   :  { %1422 = vmatpush1.bf16.msra.mxu0 %v1421_v49  ;;  %1552 = vmatprep.subr.bf16.mxu1 %v1551_v50 }
  0xe9   :  { %1424 = vmatprep.subr.bf16.mxu0 %v1423_v53 }
  0xeb   :  { %1554 = vmatpush3.bf16.msra.mxu1 %v1553_v58 }
  0xec   :  { %1426 = vmatpush1.bf16.msra.mxu0 %v1425_v59  ;;  %1556 = vmatprep.subr.bf16.mxu1 %v1555_v60 }
  0xed   :  { %1428 = vmatprep.subr.bf16.mxu0 %v1427_v63 }
  0xef   :  { %1558 = vmatpush3.bf16.msra.mxu1 %v1557_v5 }
  0xf0   :  { %1430 = vmatpush1.bf16.msra.mxu0 %v1429_v6  ;;  %1560 = vmatprep.subr.bf16.mxu1 %v1559_v7 }
  0xf1   :  { %1432 = vmatprep.subr.bf16.mxu0 %v1431_v10 }
  0xf3   :  { %1562 = vmatpush3.bf16.msra.mxu1 %v1561_v13 }
  0xf4   :  { %1434 = vmatpush1.bf16.msra.mxu0 %v1433_v17 }
  0xf6   :  { %1003 = vmatmul.mubr.f32.vlgmr.msra.gmra.mrb[8].mxu1 %v58_v14 }
  0xf7   :  { %722 = vmatmul.mubr.f32.vlgmr.msra.gmra.mrb[0].mxu0 %v58_v14 }
 0x149   :  { %v510_v15 = vpop.f32.mrb[0].mxu1 }
 0x14a   :  { %v512_v19 = vpop.f32.mrb[1].mxu1 }
 0x169   :  { %v1071_v20 = vpop.f32.mrb[2].mxu1 }
 0x16a   :  { %v1072_v21 = vpop.f32.mrb[3].mxu1 }
 0x16b   :  { %v1073_v27 = vadd.f32 %v1072_v21, %v1071_v20 }
 0x189   :  { %v1106_v22 = vpop.f32.mrb[4].mxu1 }
 0x18a   :  { %v1107_v23 = vpop.f32.mrb[5].mxu1 }
 0x18b   :  { %v1108_v42 = vadd.f32 %v1107_v23, %v1106_v22 }
 0x18d   :  { %v865_v24 = vadd.f32 %v1108_v42, %v1073_v27 }
 0x1a9   :  { %v1141_v25 = vpop.f32.mrb[6].mxu1 }
 0x1aa   :  { %v1142_v26 = vpop.f32.mrb[7].mxu1 }
 0x1ab   :  { %v1143_v28 = vadd.f32 %v1142_v26, %v1141_v25 }
 0x1ad   :  { %v935_v30 = vadd.f32 %v1143_v28, %v865_v24 }
 0x1c9   :  { %v1176_v31 = vpop.f32.mrb[8].mxu1 }
 0x1ca   :  { %v723_v32 = vpop.f32.mrb[0].mxu0  ;;  %v1177_v34 = vpop.f32.mrb[9].mxu1 }
 0x1cb   :  { %v1563_v35 = vadd.f32 %v723_v32, %v510_v15  ;;  %v725_v36 = vpop.f32.mrb[1].mxu0  ;;  %v1178_v38 = vadd.f32 %v1177_v34, %v1176_v31 }
 0x1cc   :  { %v1564_v39 = vadd.f32 %v725_v36, %v512_v19 }
 0x1cd   :  { %v1010_v41 = vmul.f32 %v1563_v35, %v1009_v33  ;;  %v1005_v43 = vadd.f32 %v1178_v38, %v935_v30 }
 0x1ce   :  { %v1013_v44 = vmul.f32 %v1564_v39, %v1012_v37 }
 0x1cf   :  { %v1017_v45 = vmul.f32 %v1016_v40, %v1005_v43 }
 0x1d0   :  { %v1014_v46 = vadd.f32 %v1013_v44, %v1010_v41 }
 0x1d2   :  { %v1018_v47 = vadd.f32 %v1017_v45, %v1014_v46 }
 0x1d4   :  { %1019 = vst [vmem:[#allocation9] sm:$0xff] %v1018_v47 }
 0x1d5   :  { %1640 = shalt.err (!%p1637_p9)
}
 0x1d6   :  { %s1641_s26 = scalar_lea.hbm %s1764_s3, 128 }
 0x1d7   :  { %p1642_p10 = scmp.ne.s32.totalorder %s1764_s3, %s1641_s26  ;;  %p1645_p11 = scmp.lt.u32.totalorder %s1641_s26, %s1764_s3 }
 0x1d9   :  { %p1647_p12 = pnand %p1645_p11, %p1642_p10 }
 0x1db   :  { %1650 = shalt.err (!%p1647_p12)
}
 0x1dc   :  { %1029 = dma.vmem_to_hbm [thread:$0]  %s1027_s22, 128, %s1764_s3, [#allocation4]  }
 0x1dd   :  { %1657 = dma.done.wait [#allocation4], 128  }
 0x1de   :  { %1658 = vsyncadd [#allocation4], 4294967168 }
 0x1df   :  { %1033 = vsyncpa [#allocation3], 1 }
 0x1e0   :  { %1034 = vsyncpa [#allocation8], 1 }
 0x1e1   :  { %1035 = vsyncpa [#allocation4], 1 }
 0x1e2   :  { %1036 = vsyncpa [#allocation5], 1 }

</bundles_post_ra>
